<compile_context>
chip_gen: v5e
topology: v5e:2x2
jax: 0.10.0
libtpu: 0.0.40
codegen_flags: <defaults>
</compile_context>

<pallas_src>
import functools

import jax
import jax.numpy as jnp
from jax import lax
from jax.experimental import pallas as pl
from jax.experimental.pallas import tpu as pltpu


# ------------------------------- Pallas kernel -------------------------------


def fused_convt_bn_act_kernel(x_ref, wt_ref, prm_ref, o_ref, pat_ref, *,
                              n, cin, cout, kh, kw, oh, ow, pw_row):
    """Fused ConvTranspose2d(stride=1,pad=0) + BatchNorm2d(train) + LeakyReLU(0.2).

    x_ref:   (N*Cin, PH_EXT*PW) spatially pre-padded input, rows flattened NC-major
    wt_ref:  (Cout, KH*KW*Cin)  flipped / IO-swapped weight, columns ordered (dy,dx,cin)
    prm_ref: (Cout, 2)          [:,0] = bn gamma, [:,1] = bn beta
    o_ref:   (N*Cout, OH*PW)    flattened NCHW output rows (PW-OW junk cols per row)
    pat_ref: (KH*KW*Cin, OH*PW) transposed, lane-dense im2col scratch
    """
    ncol = oh * pw_row
    inv_cnt = 1.0 / float(n * oh * ow)

    # Columns are (oy, ox) flattened with row stride PW; only ox < OW are real
    # output positions.  The rest are cheap junk columns excluded from the BN
    # statistics and sliced off by the wrapper.
    lane = lax.broadcasted_iota(jnp.int32, (cout, ncol), 1)
    valid = (lane % pw_row) < ow

    ssum = jnp.zeros((cout, 1), jnp.float32)
    ssq = jnp.zeros((cout, 1), jnp.float32)
    convs = []

    for nn in range(n):
        # im2col, transposed & lane-dense: row block (dy,dx) of pat is just the
        # padded rows of sample nn shifted by a static lane offset (no reshapes).
        for dy in range(kh):
            for dx in range(kw):
                col = (dy * kw + dx) * cin
                off = dy * pw_row + dx
                pat_ref[col:col + cin, :] = x_ref[nn * cin:(nn + 1) * cin,
                                                  off:off + ncol]

        # Single f32 MXU matmul per sample: (Cout, K) x (K, M) -> (Cout, M).
        conv = lax.dot_general(
            wt_ref[...], pat_ref[...],
            dimension_numbers=(((1,), (0,)), ((), ())),
            preferred_element_type=jnp.float32)
        convs.append(conv)

        cm = jnp.where(valid, conv, 0.0)
        ssum = ssum + jnp.sum(cm, axis=1, keepdims=True)
        ssq = ssq + jnp.sum(cm * cm, axis=1, keepdims=True)

    # TODO(synk): Dropout2d(p=0.5) training-mode channel masking not implemented
    # (identity / eval behavior); BN running-stat momentum updates not returned.

    # BatchNorm2d training forward: batch mean / biased variance per out-channel,
    # eps=1e-5.  The conv-transpose bias is omitted upstream: the mean subtraction
    # cancels it exactly.
    mean = ssum * inv_cnt
    var = ssq * inv_cnt - mean * mean
    inv = lax.rsqrt(var + 1e-5)
    g = prm_ref[:, 0:1] * inv            # folded scale
    b = prm_ref[:, 1:2] - mean * g       # folded shift

    # Normalize + LeakyReLU(0.2), written as flattened NCHW rows.
    for nn in range(n):
        y = convs[nn] * g + b
        o_ref[nn * cout:(nn + 1) * cout, :] = jnp.where(y > 0, y, 0.2 * y)


# ------------------------------- wrapper (glue) -------------------------------


def prepare_params(params):
    """One-time parameter preprocessing (hoisted out of the per-step path)."""
    w_t, bias, gamma, beta = params                # w_t: (Cin, Cout, KH, KW)
    del bias                                       # exactly cancelled by BN mean subtraction
    cin, cout, kh, kw = w_t.shape
    # Equivalent-conv weight: flip spatially, swap IO, flatten as (Cout, dy,dx,cin).
    w_flip = w_t[:, :, ::-1, ::-1]
    wt = jnp.transpose(w_flip, (1, 2, 3, 0)).reshape(cout, kh * kw * cin)
    prm = jnp.stack([gamma, beta], axis=1)
    return wt.astype(jnp.float32), prm.astype(jnp.float32)


@functools.partial(jax.jit, static_argnames=("kh", "kw"))
def cnn_transpose_block(x_nchw, wt, prm, *, kh, kw):
    """x_nchw: (N, Cin, H, W) f32 -> (N, Cout, H+KH-1, W+KW-1) f32."""
    n, cin, h, w = x_nchw.shape
    cout = wt.shape[0]
    oh, ow = h + kh - 1, w + kw - 1
    pw_row = w + 2 * (kw - 1)                      # padded row width
    ncol = oh * pw_row

    # Spatial zero-pad (plus kh extra bottom rows of slack so every lane-shifted
    # im2col window stays in bounds), then flatten rows lane-dense: (N*Cin, flat).
    xpad = jnp.pad(x_nchw.astype(jnp.float32),
                   ((0, 0), (0, 0), (kh - 1, kh), (kw - 1, kw - 1)))
    xflat = xpad.reshape(n * cin, -1)

    kern = functools.partial(fused_convt_bn_act_kernel, n=n, cin=cin, cout=cout,
                             kh=kh, kw=kw, oh=oh, ow=ow, pw_row=pw_row)

    out = pl.pallas_call(
        kern,
        out_shape=jax.ShapeDtypeStruct((n * cout, ncol), jnp.float32),
        scratch_shapes=[pltpu.VMEM((kh * kw * cin, ncol), jnp.float32)],
    )(xflat, wt, prm)

    # (N*Cout, OH*PW) is flattened NCHW up to the junk columns: free reshape + a
    # cheap lane slice.  No transpose.
    return out.reshape(n, cout, oh, pw_row)[:, :, :, :ow]


# --------------------------------- reference ----------------------------------


def reference(x_nchw, params):
    w_t, bias, gamma, beta = params
    cin, cout, kh, kw = w_t.shape
    # ConvTranspose2d(stride=1, pad=0) via padded correlation with flipped kernel.
    w_oihw = jnp.transpose(w_t, (1, 0, 2, 3))[:, :, ::-1, ::-1]
    conv = lax.conv_general_dilated(
        x_nchw.astype(jnp.float32), w_oihw, window_strides=(1, 1),
        padding=[(kh - 1, kh - 1), (kw - 1, kw - 1)],
        dimension_numbers=('NCHW', 'OIHW', 'NCHW'))
    conv = conv + bias[None, :, None, None]
    # Dropout2d treated as identity (see TODO in kernel).
    mean = jnp.mean(conv, axis=(0, 2, 3))
    var = jnp.mean((conv - mean[None, :, None, None]) ** 2, axis=(0, 2, 3))
    xn = ((conv - mean[None, :, None, None])
          * lax.rsqrt(var[None, :, None, None] + 1e-5)
          * gamma[None, :, None, None] + beta[None, :, None, None])
    return jnp.where(xn > 0, xn, 0.2 * xn)


# ----------------------------------- main --------------------------------------


if __name__ == "__main__":
    # Module config (small synthetic sizes)
    N, Cin, H, W = 2, 4, 16, 16
    Cout, K = 8, 3

    key = jax.random.PRNGKey(0)
    kx, kw_, kb = jax.random.split(key, 3)

    x = jax.random.normal(kx, (N, Cin, H, W), dtype=jnp.float32)

    # Deterministic parameter init (ConvTranspose2d-like uniform; BN gamma=1/beta=0)
    fan_in = Cout * K * K
    bound = 1.0 / (fan_in ** 0.5)
    w_t = jax.random.uniform(kw_, (Cin, Cout, K, K), jnp.float32, -bound, bound)
    bias = jax.random.uniform(kb, (Cout,), jnp.float32, -bound, bound)
    gamma = jnp.ones((Cout,), jnp.float32)
    beta = jnp.zeros((Cout,), jnp.float32)
    params = (w_t, bias, gamma, beta)

    wt, prm = prepare_params(params)          # one-time; reused across steps
    out = cnn_transpose_block(x, wt, prm, kh=K, kw=K)
    out = jax.block_until_ready(out)

    ref = reference(x, params)
    assert out.shape == (N, Cout, H + K - 1, W + K - 1)
    err = float(jnp.max(jnp.abs(out - ref)))
    assert jnp.allclose(out, ref, atol=2e-3, rtol=2e-3), err

    print("KERNEL_OK")
</pallas_src>

<mosaic_0001>
module attributes {stable_mosaic.version = 11 : i64} {
  func.func @fused_convt_bn_act_kernel(%arg0: memref<8x420xf32, #tpu.memory_space<vmem>>, %arg1: memref<8x36xf32, #tpu.memory_space<vmem>>, %arg2: memref<8x2xf32, #tpu.memory_space<vmem>>, %arg3: memref<16x360xf32, #tpu.memory_space<vmem>>, %arg4: memref<36x360xf32, #tpu.memory_space<vmem>>) attributes {dimension_semantics = [], scalar_prefetch = 0 : i64, scratch_operands = 1 : i64, tpu.core_type = #tpu.core_type<tc>} {
    %0 = tpu.iota {dimensions = array<i32: 1>} : vector<8x360xi32>
    %c20_i32 = arith.constant 20 : i32
    %c0_i32 = arith.constant 0 : i32
    %1 = arith.cmpi eq, %c20_i32, %c0_i32 : i32
    %c1_i32 = arith.constant 1 : i32
    %2 = arith.select %1, %c1_i32, %c20_i32 : i32
    %3 = vector.broadcast %2 : i32 to vector<8x360xi32>
    %4 = arith.remsi %0, %3 : vector<8x360xi32>
    %c0_i32_0 = arith.constant 0 : i32
    %5 = vector.broadcast %c0_i32_0 : i32 to vector<8x360xi32>
    %6 = arith.cmpi ne, %4, %5 : vector<8x360xi32>
    %c0_i32_1 = arith.constant 0 : i32
    %7 = vector.broadcast %c0_i32_1 : i32 to vector<8x360xi32>
    %8 = arith.cmpi slt, %4, %7 : vector<8x360xi32>
    %c0_i32_2 = arith.constant 0 : i32
    %9 = arith.cmpi slt, %2, %c0_i32_2 : i32
    %10 = vector.broadcast %9 : i1 to vector<8x360xi1>
    %11 = vector.broadcast %10 : vector<8x360xi1> to vector<8x360xi1>
    %12 = arith.xori %8, %11 : vector<8x360xi1>
    %13 = arith.andi %12, %6 : vector<8x360xi1>
    %14 = vector.broadcast %2 : i32 to vector<8x360xi32>
    %15 = arith.addi %4, %14 : vector<8x360xi32>
    %16 = arith.select %13, %15, %4 : vector<8x360xi1>, vector<8x360xi32>
    %c18_i32 = arith.constant 18 : i32
    %17 = vector.broadcast %c18_i32 : i32 to vector<8x360xi32>
    %18 = arith.cmpi slt, %16, %17 : vector<8x360xi32>
    %cst = arith.constant 0.000000e+00 : f32
    %19 = vector.broadcast %cst : f32 to vector<8x1xf32>
    %cst_3 = arith.constant 0.000000e+00 : f32
    %20 = vector.broadcast %cst_3 : f32 to vector<8x1xf32>
    %c0 = arith.constant 0 : index
    %c0_4 = arith.constant 0 : index
    %21 = vector.load %arg0[%c0, %c0_4] : memref<8x420xf32, #tpu.memory_space<vmem>>, vector<4x360xf32>
    %c0_5 = arith.constant 0 : index
    %c0_6 = arith.constant 0 : index
    %22 = vector.load %arg4[%c0_5, %c0_6] : memref<36x360xf32, #tpu.memory_space<vmem>>, vector<4x360xf32>
    tpu.vector_store %arg4[%c0_5, %c0_6], %21 {strides = array<i32>} : memref<36x360xf32, #tpu.memory_space<vmem>>, vector<4x360xf32>,
    %c0_7 = arith.constant 0 : index
    %c1 = arith.constant 1 : index
    %23 = vector.load %arg0[%c0_7, %c1] : memref<8x420xf32, #tpu.memory_space<vmem>>, vector<4x360xf32>
    %c4 = arith.constant 4 : index
    %c0_8 = arith.constant 0 : index
    %24 = vector.load %arg4[%c4, %c0_8] : memref<36x360xf32, #tpu.memory_space<vmem>>, vector<4x360xf32>
    tpu.vector_store %arg4[%c4, %c0_8], %23 {strides = array<i32>} : memref<36x360xf32, #tpu.memory_space<vmem>>, vector<4x360xf32>,
    %c0_9 = arith.constant 0 : index
    %c2 = arith.constant 2 : index
    %25 = vector.load %arg0[%c0_9, %c2] : memref<8x420xf32, #tpu.memory_space<vmem>>, vector<4x360xf32>
    %c8 = arith.constant 8 : index
    %c0_10 = arith.constant 0 : index
    %26 = vector.load %arg4[%c8, %c0_10] : memref<36x360xf32, #tpu.memory_space<vmem>>, vector<4x360xf32>
    tpu.vector_store %arg4[%c8, %c0_10], %25 {strides = array<i32>} : memref<36x360xf32, #tpu.memory_space<vmem>>, vector<4x360xf32>,
    %c0_11 = arith.constant 0 : index
    %c20 = arith.constant 20 : index
    %27 = vector.load %arg0[%c0_11, %c20] : memref<8x420xf32, #tpu.memory_space<vmem>>, vector<4x360xf32>
    %c12 = arith.constant 12 : index
    %c0_12 = arith.constant 0 : index
    %28 = vector.load %arg4[%c12, %c0_12] : memref<36x360xf32, #tpu.memory_space<vmem>>, vector<4x360xf32>
    tpu.vector_store %arg4[%c12, %c0_12], %27 {strides = array<i32>} : memref<36x360xf32, #tpu.memory_space<vmem>>, vector<4x360xf32>,
    %c0_13 = arith.constant 0 : index
    %c21 = arith.constant 21 : index
    %29 = vector.load %arg0[%c0_13, %c21] : memref<8x420xf32, #tpu.memory_space<vmem>>, vector<4x360xf32>
    %c16 = arith.constant 16 : index
    %c0_14 = arith.constant 0 : index
    %30 = vector.load %arg4[%c16, %c0_14] : memref<36x360xf32, #tpu.memory_space<vmem>>, vector<4x360xf32>
    tpu.vector_store %arg4[%c16, %c0_14], %29 {strides = array<i32>} : memref<36x360xf32, #tpu.memory_space<vmem>>, vector<4x360xf32>,
    %c0_15 = arith.constant 0 : index
    %c22 = arith.constant 22 : index
    %31 = vector.load %arg0[%c0_15, %c22] : memref<8x420xf32, #tpu.memory_space<vmem>>, vector<4x360xf32>
    %c20_16 = arith.constant 20 : index
    %c0_17 = arith.constant 0 : index
    %32 = vector.load %arg4[%c20_16, %c0_17] : memref<36x360xf32, #tpu.memory_space<vmem>>, vector<4x360xf32>
    tpu.vector_store %arg4[%c20_16, %c0_17], %31 {strides = array<i32>} : memref<36x360xf32, #tpu.memory_space<vmem>>, vector<4x360xf32>,
    %c0_18 = arith.constant 0 : index
    %c40 = arith.constant 40 : index
    %33 = vector.load %arg0[%c0_18, %c40] : memref<8x420xf32, #tpu.memory_space<vmem>>, vector<4x360xf32>
    %c24 = arith.constant 24 : index
    %c0_19 = arith.constant 0 : index
    %34 = vector.load %arg4[%c24, %c0_19] : memref<36x360xf32, #tpu.memory_space<vmem>>, vector<4x360xf32>
    tpu.vector_store %arg4[%c24, %c0_19], %33 {strides = array<i32>} : memref<36x360xf32, #tpu.memory_space<vmem>>, vector<4x360xf32>,
    %c0_20 = arith.constant 0 : index
    %c41 = arith.constant 41 : index
    %35 = vector.load %arg0[%c0_20, %c41] : memref<8x420xf32, #tpu.memory_space<vmem>>, vector<4x360xf32>
    %c28 = arith.constant 28 : index
    %c0_21 = arith.constant 0 : index
    %36 = vector.load %arg4[%c28, %c0_21] : memref<36x360xf32, #tpu.memory_space<vmem>>, vector<4x360xf32>
    tpu.vector_store %arg4[%c28, %c0_21], %35 {strides = array<i32>} : memref<36x360xf32, #tpu.memory_space<vmem>>, vector<4x360xf32>,
    %c0_22 = arith.constant 0 : index
    %c42 = arith.constant 42 : index
    %37 = vector.load %arg0[%c0_22, %c42] : memref<8x420xf32, #tpu.memory_space<vmem>>, vector<4x360xf32>
    %c32 = arith.constant 32 : index
    %c0_23 = arith.constant 0 : index
    %38 = vector.load %arg4[%c32, %c0_23] : memref<36x360xf32, #tpu.memory_space<vmem>>, vector<4x360xf32>
    tpu.vector_store %arg4[%c32, %c0_23], %37 {strides = array<i32>} : memref<36x360xf32, #tpu.memory_space<vmem>>, vector<4x360xf32>,
    %c0_24 = arith.constant 0 : index
    %c0_25 = arith.constant 0 : index
    %39 = vector.load %arg1[%c0_24, %c0_25] : memref<8x36xf32, #tpu.memory_space<vmem>>, vector<8x36xf32>
    %c0_26 = arith.constant 0 : index
    %c0_27 = arith.constant 0 : index
    %40 = vector.load %arg4[%c0_26, %c0_27] : memref<36x360xf32, #tpu.memory_space<vmem>>, vector<36x360xf32>
    %cst_28 = arith.constant dense<0.000000e+00> : vector<8x360xf32>
    %41 = tpu.matmul %39, %40, %cst_28 {dimension_numbers = #tpu.dot_dimension_numbers<[1], [0], [0], [1], [0, 0, 1, 1], [], []>} : vector<8x36xf32>, vector<36x360xf32>, vector<8x360xf32> -> vector<8x360xf32>
    %cst_29 = arith.constant 0.000000e+00 : f32
    %42 = vector.broadcast %cst_29 : f32 to vector<8x360xf32>
    %43 = arith.select %18, %41, %42 : vector<8x360xi1>, vector<8x360xf32>
    %cst_30 = arith.constant dense<0.000000e+00> : vector<8xf32>
    %44 = vector.multi_reduction <add>, %43, %cst_30 [1] : vector<8x360xf32> to vector<8xf32>
    %45 = vector.shape_cast %44 : vector<8xf32> to vector<8x1xf32>
    %46 = arith.addf %19, %45 : vector<8x1xf32>
    %47 = arith.mulf %43, %43 : vector<8x360xf32>
    %cst_31 = arith.constant dense<0.000000e+00> : vector<8xf32>
    %48 = vector.multi_reduction <add>, %47, %cst_31 [1] : vector<8x360xf32> to vector<8xf32>
    %49 = vector.shape_cast %48 : vector<8xf32> to vector<8x1xf32>
    %50 = arith.addf %20, %49 : vector<8x1xf32>
    %c4_32 = arith.constant 4 : index
    %c0_33 = arith.constant 0 : index
    %51 = vector.load %arg0[%c4_32, %c0_33] : memref<8x420xf32, #tpu.memory_space<vmem>>, vector<4x360xf32>
    %c0_34 = arith.constant 0 : index
    %c0_35 = arith.constant 0 : index
    %52 = vector.load %arg4[%c0_34, %c0_35] : memref<36x360xf32, #tpu.memory_space<vmem>>, vector<4x360xf32>
    tpu.vector_store %arg4[%c0_34, %c0_35], %51 {strides = array<i32>} : memref<36x360xf32, #tpu.memory_space<vmem>>, vector<4x360xf32>,
    %c4_36 = arith.constant 4 : index
    %c1_37 = arith.constant 1 : index
    %53 = vector.load %arg0[%c4_36, %c1_37] : memref<8x420xf32, #tpu.memory_space<vmem>>, vector<4x360xf32>
    %c4_38 = arith.constant 4 : index
    %c0_39 = arith.constant 0 : index
    %54 = vector.load %arg4[%c4_38, %c0_39] : memref<36x360xf32, #tpu.memory_space<vmem>>, vector<4x360xf32>
    tpu.vector_store %arg4[%c4_38, %c0_39], %53 {strides = array<i32>} : memref<36x360xf32, #tpu.memory_space<vmem>>, vector<4x360xf32>,
    %c4_40 = arith.constant 4 : index
    %c2_41 = arith.constant 2 : index
    %55 = vector.load %arg0[%c4_40, %c2_41] : memref<8x420xf32, #tpu.memory_space<vmem>>, vector<4x360xf32>
    %c8_42 = arith.constant 8 : index
    %c0_43 = arith.constant 0 : index
    %56 = vector.load %arg4[%c8_42, %c0_43] : memref<36x360xf32, #tpu.memory_space<vmem>>, vector<4x360xf32>
    tpu.vector_store %arg4[%c8_42, %c0_43], %55 {strides = array<i32>} : memref<36x360xf32, #tpu.memory_space<vmem>>, vector<4x360xf32>,
    %c4_44 = arith.constant 4 : index
    %c20_45 = arith.constant 20 : index
    %57 = vector.load %arg0[%c4_44, %c20_45] : memref<8x420xf32, #tpu.memory_space<vmem>>, vector<4x360xf32>
    %c12_46 = arith.constant 12 : index
    %c0_47 = arith.constant 0 : index
    %58 = vector.load %arg4[%c12_46, %c0_47] : memref<36x360xf32, #tpu.memory_space<vmem>>, vector<4x360xf32>
    tpu.vector_store %arg4[%c12_46, %c0_47], %57 {strides = array<i32>} : memref<36x360xf32, #tpu.memory_space<vmem>>, vector<4x360xf32>,
    %c4_48 = arith.constant 4 : index
    %c21_49 = arith.constant 21 : index
    %59 = vector.load %arg0[%c4_48, %c21_49] : memref<8x420xf32, #tpu.memory_space<vmem>>, vector<4x360xf32>
    %c16_50 = arith.constant 16 : index
    %c0_51 = arith.constant 0 : index
    %60 = vector.load %arg4[%c16_50, %c0_51] : memref<36x360xf32, #tpu.memory_space<vmem>>, vector<4x360xf32>
    tpu.vector_store %arg4[%c16_50, %c0_51], %59 {strides = array<i32>} : memref<36x360xf32, #tpu.memory_space<vmem>>, vector<4x360xf32>,
    %c4_52 = arith.constant 4 : index
    %c22_53 = arith.constant 22 : index
    %61 = vector.load %arg0[%c4_52, %c22_53] : memref<8x420xf32, #tpu.memory_space<vmem>>, vector<4x360xf32>
    %c20_54 = arith.constant 20 : index
    %c0_55 = arith.constant 0 : index
    %62 = vector.load %arg4[%c20_54, %c0_55] : memref<36x360xf32, #tpu.memory_space<vmem>>, vector<4x360xf32>
    tpu.vector_store %arg4[%c20_54, %c0_55], %61 {strides = array<i32>} : memref<36x360xf32, #tpu.memory_space<vmem>>, vector<4x360xf32>,
    %c4_56 = arith.constant 4 : index
    %c40_57 = arith.constant 40 : index
    %63 = vector.load %arg0[%c4_56, %c40_57] : memref<8x420xf32, #tpu.memory_space<vmem>>, vector<4x360xf32>
    %c24_58 = arith.constant 24 : index
    %c0_59 = arith.constant 0 : index
    %64 = vector.load %arg4[%c24_58, %c0_59] : memref<36x360xf32, #tpu.memory_space<vmem>>, vector<4x360xf32>
    tpu.vector_store %arg4[%c24_58, %c0_59], %63 {strides = array<i32>} : memref<36x360xf32, #tpu.memory_space<vmem>>, vector<4x360xf32>,
    %c4_60 = arith.constant 4 : index
    %c41_61 = arith.constant 41 : index
    %65 = vector.load %arg0[%c4_60, %c41_61] : memref<8x420xf32, #tpu.memory_space<vmem>>, vector<4x360xf32>
    %c28_62 = arith.constant 28 : index
    %c0_63 = arith.constant 0 : index
    %66 = vector.load %arg4[%c28_62, %c0_63] : memref<36x360xf32, #tpu.memory_space<vmem>>, vector<4x360xf32>
    tpu.vector_store %arg4[%c28_62, %c0_63], %65 {strides = array<i32>} : memref<36x360xf32, #tpu.memory_space<vmem>>, vector<4x360xf32>,
    %c4_64 = arith.constant 4 : index
    %c42_65 = arith.constant 42 : index
    %67 = vector.load %arg0[%c4_64, %c42_65] : memref<8x420xf32, #tpu.memory_space<vmem>>, vector<4x360xf32>
    %c32_66 = arith.constant 32 : index
    %c0_67 = arith.constant 0 : index
    %68 = vector.load %arg4[%c32_66, %c0_67] : memref<36x360xf32, #tpu.memory_space<vmem>>, vector<4x360xf32>
    tpu.vector_store %arg4[%c32_66, %c0_67], %67 {strides = array<i32>} : memref<36x360xf32, #tpu.memory_space<vmem>>, vector<4x360xf32>,
    %c0_68 = arith.constant 0 : index
    %c0_69 = arith.constant 0 : index
    %69 = vector.load %arg1[%c0_68, %c0_69] : memref<8x36xf32, #tpu.memory_space<vmem>>, vector<8x36xf32>
    %c0_70 = arith.constant 0 : index
    %c0_71 = arith.constant 0 : index
    %70 = vector.load %arg4[%c0_70, %c0_71] : memref<36x360xf32, #tpu.memory_space<vmem>>, vector<36x360xf32>
    %cst_72 = arith.constant dense<0.000000e+00> : vector<8x360xf32>
    %71 = tpu.matmul %69, %70, %cst_72 {dimension_numbers = #tpu.dot_dimension_numbers<[1], [0], [0], [1], [0, 0, 1, 1], [], []>} : vector<8x36xf32>, vector<36x360xf32>, vector<8x360xf32> -> vector<8x360xf32>
    %cst_73 = arith.constant 0.000000e+00 : f32
    %72 = vector.broadcast %cst_73 : f32 to vector<8x360xf32>
    %73 = arith.select %18, %71, %72 : vector<8x360xi1>, vector<8x360xf32>
    %cst_74 = arith.constant dense<0.000000e+00> : vector<8xf32>
    %74 = vector.multi_reduction <add>, %73, %cst_74 [1] : vector<8x360xf32> to vector<8xf32>
    %75 = vector.shape_cast %74 : vector<8xf32> to vector<8x1xf32>
    %76 = arith.addf %46, %75 : vector<8x1xf32>
    %77 = arith.mulf %73, %73 : vector<8x360xf32>
    %cst_75 = arith.constant dense<0.000000e+00> : vector<8xf32>
    %78 = vector.multi_reduction <add>, %77, %cst_75 [1] : vector<8x360xf32> to vector<8xf32>
    %79 = vector.shape_cast %78 : vector<8xf32> to vector<8x1xf32>
    %80 = arith.addf %50, %79 : vector<8x1xf32>
    %cst_76 = arith.constant 0.00154320989 : f32
    %81 = vector.broadcast %cst_76 : f32 to vector<8x1xf32>
    %82 = arith.mulf %76, %81 : vector<8x1xf32>
    %cst_77 = arith.constant 0.00154320989 : f32
    %83 = vector.broadcast %cst_77 : f32 to vector<8x1xf32>
    %84 = arith.mulf %80, %83 : vector<8x1xf32>
    %85 = arith.mulf %82, %82 : vector<8x1xf32>
    %86 = arith.subf %84, %85 : vector<8x1xf32>
    %cst_78 = arith.constant 9.99999974E-6 : f32
    %87 = vector.broadcast %cst_78 : f32 to vector<8x1xf32>
    %88 = arith.addf %86, %87 : vector<8x1xf32>
    %89 = math.rsqrt %88 : vector<8x1xf32>
    %c0_79 = arith.constant 0 : index
    %c0_80 = arith.constant 0 : index
    %90 = vector.load %arg2[%c0_79, %c0_80] : memref<8x2xf32, #tpu.memory_space<vmem>>, vector<8x1xf32>
    %91 = arith.mulf %90, %89 : vector<8x1xf32>
    %c0_81 = arith.constant 0 : index
    %c1_82 = arith.constant 1 : index
    %92 = vector.load %arg2[%c0_81, %c1_82] : memref<8x2xf32, #tpu.memory_space<vmem>>, vector<8x1xf32>
    %93 = arith.mulf %82, %91 : vector<8x1xf32>
    %94 = arith.subf %92, %93 : vector<8x1xf32>
    %95 = vector.broadcast %91 : vector<8x1xf32> to vector<8x360xf32>
    %96 = arith.mulf %41, %95 : vector<8x360xf32>
    %97 = vector.broadcast %94 : vector<8x1xf32> to vector<8x360xf32>
    %98 = arith.addf %96, %97 : vector<8x360xf32>
    %cst_83 = arith.constant 0.000000e+00 : f32
    %99 = vector.broadcast %cst_83 : f32 to vector<8x360xf32>
    %100 = arith.cmpf ogt, %98, %99 : vector<8x360xf32>
    %cst_84 = arith.constant 2.000000e-01 : f32
    %101 = vector.broadcast %cst_84 : f32 to vector<8x360xf32>
    %102 = arith.mulf %101, %98 : vector<8x360xf32>
    %103 = arith.select %100, %98, %102 : vector<8x360xi1>, vector<8x360xf32>
    %c0_85 = arith.constant 0 : index
    %c0_86 = arith.constant 0 : index
    %104 = vector.load %arg3[%c0_85, %c0_86] : memref<16x360xf32, #tpu.memory_space<vmem>>, vector<8x360xf32>
    tpu.vector_store %arg3[%c0_85, %c0_86], %103 {strides = array<i32>} : memref<16x360xf32, #tpu.memory_space<vmem>>, vector<8x360xf32>,
    %105 = vector.broadcast %91 : vector<8x1xf32> to vector<8x360xf32>
    %106 = arith.mulf %71, %105 : vector<8x360xf32>
    %107 = vector.broadcast %94 : vector<8x1xf32> to vector<8x360xf32>
    %108 = arith.addf %106, %107 : vector<8x360xf32>
    %cst_87 = arith.constant 0.000000e+00 : f32
    %109 = vector.broadcast %cst_87 : f32 to vector<8x360xf32>
    %110 = arith.cmpf ogt, %108, %109 : vector<8x360xf32>
    %cst_88 = arith.constant 2.000000e-01 : f32
    %111 = vector.broadcast %cst_88 : f32 to vector<8x360xf32>
    %112 = arith.mulf %111, %108 : vector<8x360xf32>
    %113 = arith.select %110, %108, %112 : vector<8x360xi1>, vector<8x360xf32>
    %c8_89 = arith.constant 8 : index
    %c0_90 = arith.constant 0 : index
    %114 = vector.load %arg3[%c8_89, %c0_90] : memref<16x360xf32, #tpu.memory_space<vmem>>, vector<8x360xf32>
    tpu.vector_store %arg3[%c8_89, %c0_90], %113 {strides = array<i32>} : memref<16x360xf32, #tpu.memory_space<vmem>>, vector<8x360xf32>,
    return
  }
}

</mosaic_0001>

<bundles_post_ra>
// kernel: cnn_transpose_block.1
= control target key start
LH: loop header
LB: loop body
LE: loop exit
PB: predicated region body
PF: predicated region fallthrough
CT: control target
= control target key end

     0   :  { %s847_s18 = smov 86   ;;  %s848_s19 = smov 88   ;;  %vm291_vm0 = vcmask 711680   ;;  %vm317_vm1 = vcmask 703488   ;;  %vm261_vm2 = vcmask 719872   ;;  %vm212_vm3 = vcmask 875520   ;;  %s1308_s0 = inlined_call_operand.vmem [shape: f32[8,420], index: 0, kind: input, shape index: {}]   ;;  %s1309_s1 = inlined_call_operand.vmem [shape: f32[8,36], index: 1, kind: input, shape index: {}]   ;;  %s1310_s2 = inlined_call_operand.vmem [shape: f32[8,2], index: 2, kind: input, shape index: {}]   ;;  %s1311_s3 = inlined_call_operand.vmem [shape: f32[16,360], index: 3, kind: output, shape index: {}]  }
   0x1   :  { %v301_v0 = vld [vmem:[%s1308_s0] sm:$0xf]  ;;  %s849_s20 = smov 87   ;;  %v272_v4 = vld [vmem:[%s1308_s0 + $0x8] sm:$0xf]  ;;  %s850_s6 = smov 107  }
   0x2   :  { %v245_v1 = vld [vmem:[%s1308_s0] sm:$0xf]  ;;  %309 = vrot.lane.b32.xlu0 %v301_v0, %s847_s18  ;;  %v302_v5 = vld [vmem:[%s1308_s0 + $0x8] sm:$0xf]  ;;  %v280_v7 = vrot.slane %v272_v4, 4  ;;  %s851_s9 = smov 106  }
   0x3   :  { %v271_v2 = vld [vmem:[%s1308_s0] sm:$0xf]  ;;  %253 = vrot.lane.b32.xlu1 %v245_v1, %s848_s19  ;;  %v246_v6 = vld [vmem:[%s1308_s0 + $0x8] sm:$0xf]  ;;  %s852_s14 = smov 126   ;;  %s853_s24 = smov 108  }
   0x4   :  { %v279_v3 = vrot.slane %v271_v2, 4  ;;  %v221_v8 = vld [vmem:[%s1308_s0] sm:$0xf]  ;;  %v201_v9 = vld [vmem:[%s1308_s0 + $0x8] sm:$0xf]  ;;  %s854_s4 = smov 127  }
   0x5   :  { %v200_v10 = vld [vmem:[%s1308_s0] sm:$0xf]  ;;  %v227_v11 = vrot.slane %v221_v8, 4  ;;  %v222_v12 = vld [vmem:[%s1308_s0 + $0x8] sm:$0xf]  ;;  %vm347_vm4 = vcmask 1043456  }
   0x6   :  { %283 = vrot.lane.b32.xlu2 %v279_v3, %s849_s20  ;;  %v228_v13 = vrot.slane %v222_v12, 4  ;;  %v155_v14 = vld [vmem:[%s1308_s0] sm:$0xf]  ;;  %v156_v15 = vld [vmem:[%s1308_s0 + $0x8] sm:$0xf]  ;;  %vm236_vm5 = vcmask 867328  }
   0x7   :  { %v176_v16 = vld [vmem:[%s1308_s0] sm:$0xf]  ;;  %v177_v17 = vld [vmem:[%s1308_s0 + $0x8] sm:$0xf]  ;;  %v303_v20 = vld [vmem:[%s1308_s0 + $0x10] sm:$0xf] }
   0x8   :  { %v182_v18 = vrot.slane %v176_v16, 4  ;;  %v183_v19 = vrot.slane %v177_v17, 4  ;;  %v130_v21 = vld [vmem:[%s1308_s0] sm:$0xf]  ;;  %v131_v22 = vld [vmem:[%s1308_s0 + $0x8] sm:$0xf] }
   0x9   :  { %v136_v23 = vrot.slane %v130_v21, 4  ;;  %v304_v24 = vld [vmem:[%s1308_s0 + $0x18] sm:$0xf]  ;;  %v137_v25 = vrot.slane %v131_v22, 4  ;;  %v273_v26 = vld [vmem:[%s1308_s0 + $0x10] sm:$0xf] }
   0xa   :  { %311 = vrot.lane.b32.xlu0 %v302_v5, %s847_s18  ;;  %v611_v27 = vld [vmem:[%s1308_s0] sm:$0xf0]  ;;  %v281_v28 = vrot.slane %v273_v26, 4  ;;  %v247_v29 = vld [vmem:[%s1308_s0 + $0x10] sm:$0xf]  ;;  %vm167_vm6 = vcmask 1031168  }
   0xb   :  { %255 = vrot.lane.b32.xlu1 %v246_v6, %s848_s19  ;;  %v619_v30 = vrot.slane %v611_v27, 4  ;;  %v612_v31 = vld [vmem:[%s1308_s0 + $0x8] sm:$0xf0]  ;;  %v274_v32 = vld [vmem:[%s1308_s0 + $0x18] sm:$0xf]  ;;  %vm191_vm7 = vcmask 883712  }
   0xc   :  { %v620_v33 = vrot.slane %v612_v31, 4  ;;  %v248_v34 = vld [vmem:[%s1308_s0 + $0x18] sm:$0xf]  ;;  %v282_v35 = vrot.slane %v274_v32, 4  ;;  %v223_v36 = vld [vmem:[%s1308_s0 + $0x10] sm:$0xf] }
   0xd   :  { %v557_v37 = vld [vmem:[%s1308_s0] sm:$0xf0]  ;;  %v229_v38 = vrot.slane %v223_v36, 4  ;;  %v202_v39 = vld [vmem:[%s1308_s0 + $0x10] sm:$0xf]  ;;  %vm145_vm8 = vcmask 1039360  }
   0xe   :  { %285 = vrot.lane.b32.xlu2 %v280_v7, %s849_s20  ;;  %v565_v40 = vrot.slane %v557_v37, 4  ;;  %v558_v41 = vld [vmem:[%s1308_s0 + $0x8] sm:$0xf0]  ;;  %v586_v43 = vld [vmem:[%s1308_s0] sm:$0xf0]  ;;  %vm128_vm9 = vcmask 846848  }
   0xf   :  { %v566_v42 = vrot.slane %v558_v41, 4  ;;  %v587_v44 = vld [vmem:[%s1308_s0 + $0x8] sm:$0xf0]  ;;  %v178_v45 = vld [vmem:[%s1308_s0 + $0x10] sm:$0xf]  ;;  %vm153_vm10 = vcmask 850948  }
  0x10   :  { %v514_v46 = vld [vmem:[%s1308_s0] sm:$0xf0]  ;;  %v184_v47 = vrot.slane %v178_v45, 4  ;;  %v157_v48 = vld [vmem:[%s1308_s0 + $0x10] sm:$0xf]  ;;  %vm343_vm11 = vcmask 293888  }
  0x11   :  { %v520_v49 = vrot.slane %v514_v46, 4  ;;  %v515_v50 = vld [vmem:[%s1308_s0 + $0x8] sm:$0xf0]  ;;  %v537_v52 = vld [vmem:[%s1308_s0] sm:$0xf0]  ;;  %s856_s8 = smov 1  }
  0x12   :  { %206 = vrot.lane.b32.xlu0 %v200_v10, %s850_s6  ;;  %v521_v51 = vrot.slane %v515_v50, 4  ;;  %v538_v53 = vld [vmem:[%s1308_s0 + $0x8] sm:$0xf0]  ;;  %v132_v54 = vld [vmem:[%s1308_s0 + $0x10] sm:$0xf] }
  0x13   :  { %208 = vrot.lane.b32.xlu1 %v201_v9, %s850_s6  ;;  %v471_v55 = vld [vmem:[%s1308_s0] sm:$0xf0]  ;;  %v472_v56 = vld [vmem:[%s1308_s0 + $0x8] sm:$0xf0]  ;;  %v138_v58 = vrot.slane %v132_v54, 4 }
  0x14   :  { %v477_v59 = vrot.slane %v471_v55, 4  ;;  %v478_v60 = vrot.slane %v472_v56, 4  ;;  %v613_v61 = vld [vmem:[%s1308_s0 + $0x10] sm:$0xf0]  ;;  %v494_v0 = vld [vmem:[%s1308_s0] sm:$0xf0] }
  0x15   :  { %v495_v1 = vld [vmem:[%s1308_s0 + $0x8] sm:$0xf0]  ;;  %v621_v2 = vrot.slane %v613_v61, 4  ;;  %v614_v3 = vld [vmem:[%s1308_s0 + $0x18] sm:$0xf0] }
  0x16   :  { %230 = vrot.lane.b32.xlu2 %v227_v11, %s851_s9  ;;  %v622_v5 = vrot.slane %v614_v3, 4  ;;  %v451_v6 = vld [vmem:[%s1308_s0] sm:$0xf0]  ;;  %v452_v7 = vld [vmem:[%s1308_s0 + $0x8] sm:$0xf0] }
  0x17   :  { %v559_v8 = vld [vmem:[%s1308_s0 + $0x10] sm:$0xf0]  ;;  %v560_v11 = vld [vmem:[%s1308_s0 + $0x18] sm:$0xf0]  ;;  %v436_v54 = vld [vmem:[%s1308_s0] sm:$0xf0] }
  0x18   :  { %v516_v16 = vld [vmem:[%s1308_s0 + $0x10] sm:$0xf0]  ;;  %v442_v61 = vrot.slane %v436_v54, 4 }
  0x19   :  { %v522_v22 = vrot.slane %v516_v16, 4  ;;  %v539_v26 = vld [vmem:[%s1308_s0 + $0x10] sm:$0xf0] }
  0x1a   :  { %232 = vrot.lane.b32.xlu0 %v228_v13, %s851_s9  ;;  %v567_v13 = vrot.slane %v559_v8, 4  ;;  %v473_v27 = vld [vmem:[%s1308_s0 + $0x10] sm:$0xf0] }
  0x1b   :  { %161 = vrot.lane.b32.xlu1 %v155_v14, %s852_s14  ;;  %v588_v14 = vld [vmem:[%s1308_s0 + $0x10] sm:$0xf0] }
  0x1c   :  { %v496_v36 = vld [vmem:[%s1308_s0 + $0x10] sm:$0xf0] }
  0x1d   :  { %v453_v37 = vld [vmem:[%s1308_s0 + $0x10] sm:$0xf0] }
  0x1e   :  { %163 = vrot.lane.b32.xlu2 %v156_v15, %s852_s14  ;;  %v568_v15 = vrot.slane %v560_v11, 4 }
  0x22   :  { %185 = vrot.lane.b32.xlu0 %v182_v18, %s853_s24 }
  0x23   :  { %187 = vrot.lane.b32.xlu1 %v183_v19, %s853_s24 }
  0x26   :  { %313 = vrot.lane.b32.xlu2 %v303_v20, %s847_s18 }
  0x2a   :  { %315 = vrot.lane.b32.xlu0 %v304_v24, %s847_s18  ;;  %v589_v24 = vld [vmem:[%s1308_s0 + $0x18] sm:$0xf0] }
  0x2b   :  { %139 = vrot.lane.b32.xlu1 %v136_v23, %s854_s4 }
  0x2e   :  { %141 = vrot.lane.b32.xlu2 %v137_v25, %s854_s4  ;;  %v123_v25 = vld [vmem:[%s1308_s0] sm:$0xf] }
  0x2f   :  { %126 = vst [vmem:[#allocation2] sm:$0xf] %v123_v25 }
  0x32   :  { %257 = vrot.lane.b32.xlu0 %v247_v29, %s848_s19 }
  0x33   :  { %287 = vrot.lane.b32.xlu1 %v281_v28, %s849_s20 }
  0x36   :  { %623 = vrot.lane.b32.xlu2 %v619_v30, %s847_s18 }
  0x3a   :  { %625 = vrot.lane.b32.xlu0 %v620_v33, %s847_s18  ;;  %v479_v33 = vrot.slane %v473_v27, 4 }
  0x3b   :  { %259 = vrot.lane.b32.xlu1 %v248_v34, %s848_s19 }
  0x3e   :  { %289 = vrot.lane.b32.xlu2 %v282_v35, %s849_s20 }
  0x42   :  { %210 = vrot.lane.b32.xlu0 %v202_v39, %s850_s6 }
  0x43   :  { %234 = vrot.lane.b32.xlu1 %v229_v38, %s851_s9 }
  0x46   :  { %569 = vrot.lane.b32.xlu2 %v565_v40, %s848_s19 }
  0x4a   :  { %571 = vrot.lane.b32.xlu0 %v566_v42, %s848_s19 }
  0x4b   :  { %594 = vrot.lane.b32.xlu1 %v586_v43, %s849_s20 }
  0x4e   :  { %596 = vrot.lane.b32.xlu2 %v587_v44, %s849_s20 }
  0x52   :  { %165 = vrot.lane.b32.xlu0 %v157_v48, %s852_s14 }
  0x53   :  { %189 = vrot.lane.b32.xlu1 %v184_v47, %s853_s24 }
  0x56   :  { %523 = vrot.lane.b32.xlu2 %v520_v49, %s850_s6 }
  0x5a   :  { %525 = vrot.lane.b32.xlu0 %v521_v51, %s850_s6 }
  0x5b   :  { %543 = vrot.lane.b32.xlu1 %v537_v52, %s851_s9 }
  0x5e   :  { %545 = vrot.lane.b32.xlu2 %v538_v53, %s851_s9 }
  0x60   :  { %v284_v57 = vpop.permute.xlu2 %283 }
  0x62   :  { %143 = vrot.lane.b32.xlu0 %v138_v58, %s854_s4 }
  0x63   :  { %480 = vrot.lane.b32.xlu1 %v477_v59, %s852_s14 }
  0x66   :  { %482 = vrot.lane.b32.xlu2 %v478_v60, %s852_s14 }
  0x68   :  { %v1037_v62 = vpop.permute.xlu2 %285 }
  0x69   :  { %v292_v63 = vsel %vm291_vm0, %v284_v57, %v1037_v62 }
  0x6a   :  { %298 = vst [vmem:[#allocation2 + $0x48] sm:$0xf0] %v292_v63  ;;  %500 = vrot.lane.b32.xlu0 %v494_v0, %s853_s24 }
  0x6b   :  { %502 = vrot.lane.b32.xlu1 %v495_v1, %s853_s24 }
  0x6e   :  { %627 = vrot.lane.b32.xlu2 %v621_v2, %s847_s18 }
  0x70   :  { %v1053_v4 = vpop.permute.xlu2 %230 }
  0x72   :  { %629 = vrot.lane.b32.xlu0 %v622_v5, %s847_s18 }
  0x73   :  { %457 = vrot.lane.b32.xlu1 %v451_v6, %s854_s4 }
  0x74   :  { %v310_v9 = vpop.permute.xlu0 %309 }
  0x75   :  { %v254_v10 = vpop.permute.xlu1 %253 }
  0x76   :  { %459 = vrot.lane.b32.xlu2 %v452_v7, %s854_s4 }
  0x78   :  { %v1070_v12 = vpop.permute.xlu2 %163 }
  0x7a   :  { %573 = vrot.lane.b32.xlu0 %v567_v13, %s848_s19 }
  0x7b   :  { %598 = vrot.lane.b32.xlu1 %v588_v14, %s849_s20  ;;  %v125_v14 = vld [vmem:[%s1308_s0 + $0x10] sm:$0xf] }
  0x7c   :  { %v312_v17 = vpop.permute.xlu0 %311  ;;  %129 = vst.msk [vmem:[#allocation2 + $0x10] sm:$0xf] %vm128_vm9, %v125_v14 }
  0x7d   :  { %v1080_v18 = vpop.permute.xlu1 %255  ;;  %v318_v19 = vsel %vm317_vm1, %v310_v9, %v312_v17 }
  0x7e   :  { %575 = vrot.lane.b32.xlu2 %v568_v15, %s848_s19  ;;  %v262_v20 = vsel %vm261_vm2, %v254_v10, %v1080_v18  ;;  %324 = vst [vmem:[#allocation2 + $0x60] sm:$0xf] %v318_v19  ;;  %v124_v15 = vld [vmem:[%s1308_s0 + $0x8] sm:$0xf] }
  0x7f   :  { %268 = vst [vmem:[#allocation2 + $0x48] sm:$0xf] %v262_v20 }
  0x80   :  { %v314_v21 = vpop.permute.xlu2 %313  ;;  %127 = vst [vmem:[#allocation2 + $0x8] sm:$0xf] %v124_v15 }
  0x81   :  { %v319_v23 = vsel %vm317_vm1, %v312_v17, %v314_v21 }
  0x82   :  { %325 = vst [vmem:[#allocation2 + $0x68] sm:$0xf] %v319_v23  ;;  %600 = vrot.lane.b32.xlu0 %v589_v24, %s849_s20 }
  0x83   :  { %527 = vrot.lane.b32.xlu1 %v522_v22, %s850_s6 }
  0x84   :  { %v207_v29 = vpop.permute.xlu0 %206 }
  0x85   :  { %v1101_v28 = vpop.permute.xlu1 %208  ;;  %v340_v31 = vld [vmem:[#allocation2 + $0x60] sm:$0xf] }
  0x86   :  { %547 = vrot.lane.b32.xlu2 %v539_v26, %s851_s9  ;;  %v213_v30 = vsel %vm212_vm3, %v207_v29, %v1101_v28  ;;  %819 = vmatpush.msk.msra.mxu0 %vm347_vm4, %v340_v31  ;;  %v337_v34 = vld [vmem:[#allocation2 + $0x48] sm:$0xff] }
  0x87   :  { %218 = vst [vmem:[#allocation2 + $0x30] sm:$0xf] %v213_v30 }
  0x88   :  { %v1107_v32 = vpop.permute.xlu2 %141  ;;  %369 = vmatpush.msra.mxu0 %v337_v34 }
  0x89   :  { %v341_v35 = vld [vmem:[#allocation2 + $0x68] sm:$0xf] }
  0x8a   :  { %821 = vmatpush.msk.msra.mxu1 %vm347_vm4, %v341_v35  ;;  %484 = vrot.lane.b32.xlu0 %v479_v33, %s852_s14 }
  0x8b   :  { %504 = vrot.lane.b32.xlu1 %v496_v36, %s853_s24 }
  0x8c   :  { %v233_v38 = vpop.permute.xlu0 %232 }
  0x8d   :  { %v162_v39 = vpop.permute.xlu1 %161  ;;  %v237_v40 = vsel %vm236_vm5, %v1053_v4, %v233_v38 }
  0x8e   :  { %461 = vrot.lane.b32.xlu2 %v453_v37, %s854_s4  ;;  %v168_v41 = vsel %vm167_vm6, %v162_v39, %v1070_v12  ;;  %242 = vst [vmem:[#allocation2 + $0x30] sm:$0xf0] %v237_v40 }
  0x8f   :  { %173 = vst [vmem:[#allocation2 + $0x18] sm:$0xf] %v168_v41 }
  0x90   :  { %v624_v42 = vpop.permute.xlu2 %623 }
  0x94   :  { %v186_v43 = vpop.permute.xlu0 %185 }
  0x95   :  { %v1123_v44 = vpop.permute.xlu1 %187  ;;  %v334_v46 = vld [vmem:[#allocation2 + $0x30] sm:$0xff] }
  0x96   :  { %v192_v45 = vsel %vm191_vm7, %v186_v43, %v1123_v44  ;;  %370 = vmatpush.msra.mxu0 %v334_v46  ;;  %v437_v46 = vld [vmem:[%s1308_s0 + $0x8] sm:$0xf0] }
  0x97   :  { %197 = vst [vmem:[#allocation2 + $0x18] sm:$0xf0] %v192_v45 }
  0x98   :  { %v290_v47 = vpop.permute.xlu2 %289 }
  0x9c   :  { %v316_v48 = vpop.permute.xlu0 %315 }
  0x9d   :  { %v140_v49 = vpop.permute.xlu1 %139  ;;  %v320_v50 = vsel %vm317_vm1, %v314_v21, %v316_v48 }
  0x9e   :  { %v146_v51 = vsel %vm145_vm8, %v140_v49, %v1107_v32  ;;  %v331_v52 = vld [vmem:[#allocation2 + $0x18] sm:$0xff]  ;;  %326 = vst.msk [vmem:[#allocation2 + $0x70] sm:$0xf] %vm128_vm9, %v320_v50 }
  0x9f   :  { %371 = vmatpush.msra.mxu0 %v331_v52  ;;  %151 = vst [vmem:[#allocation2] sm:$0xf0] %v146_v51  ;;  %v443_v51 = vrot.slane %v437_v46, 4 }
  0xa0   :  { %v570_v53 = vpop.permute.xlu2 %569 }
  0xa4   :  { %v258_v55 = vpop.permute.xlu0 %257 }
  0xa5   :  { %v288_v56 = vpop.permute.xlu1 %287  ;;  %v263_v57 = vsel %vm261_vm2, %v1080_v18, %v258_v55  ;;  %v342_v60 = vld [vmem:[#allocation2 + $0x70] sm:$0xf] }
  0xa6   :  { %v293_v58 = vsel %vm291_vm0, %v1037_v62, %v288_v56  ;;  %v294_v59 = vsel %vm291_vm0, %v288_v56, %v290_v47  ;;  %269 = vst [vmem:[#allocation2 + $0x50] sm:$0xf] %v263_v57  ;;  %823 = vmatpush.msk.msra.mxu2 %vm347_vm4, %v342_v60  ;;  %v328_v0 = vld [vmem:[#allocation2] sm:$0xff] }
  0xa7   :  { %299 = vst [vmem:[#allocation2 + $0x50] sm:$0xf0] %v293_v58  ;;  %372 = vmatpush.msra.mxu0 %v328_v0 }
  0xa8   :  { %v1140_v63 = vpop.permute.xlu2 %596  ;;  %300 = vst.msk [vmem:[#allocation2 + $0x58] sm:$0xf0] %vm153_vm10, %v294_v59 }
  0xa9   :  { %448 = vst [vmem:[#allocation2] sm:$0xf] %v442_v61 }
  0xac   :  { %v626_v1 = vpop.permute.xlu0 %625 }
  0xad   :  { %v260_v2 = vpop.permute.xlu1 %259  ;;  %v631_v3 = vsel %vm317_vm1, %v624_v42, %v626_v1 }
  0xae   :  { %v264_v62 = vsel %vm261_vm2, %v258_v55, %v260_v2  ;;  %637 = vst [vmem:[#allocation2 + $0x60] sm:$0xf] %v631_v3  ;;  %v338_v5 = vld [vmem:[#allocation2 + $0x50] sm:$0xff]  ;;  %v855_v2 = vmov 0  }
  0xaf   :  { %270 = vst.msk [vmem:[#allocation2 + $0x58] sm:$0xf] %vm128_vm9, %v264_v62  ;;  %389 = vmatpush.msra.mxu1 %v338_v5  ;;  %842 = vset.pattern.permute.xlu1 %v855_v2 }
  0xb0   :  { %v524_v4 = vpop.permute.xlu2 %523 }
  0xb4   :  { %v211_v6 = vpop.permute.xlu0 %210 }
  0xb5   :  { %v235_v7 = vpop.permute.xlu1 %234  ;;  %v214_v8 = vsel %vm212_vm3, %v1101_v28, %v211_v6  ;;  %220 = vst.msk [vmem:[#allocation2 + $0x40] sm:$0xf] %vm128_vm9, %v211_v6  ;;  %v653_v10 = vld [vmem:[#allocation2 + $0x60] sm:$0xf] }
  0xb6   :  { %v238_v9 = vsel %vm236_vm5, %v233_v38, %v235_v7  ;;  %219 = vst [vmem:[#allocation2 + $0x38] sm:$0xf] %v214_v8  ;;  %825 = vmatpush.msk.msra.mxu3 %vm347_vm4, %v653_v10  ;;  %v339_v13 = vld [vmem:[#allocation2 + $0x58] sm:$0xff] }
  0xb7   :  { %243 = vst [vmem:[#allocation2 + $0x38] sm:$0xf0] %v238_v9  ;;  %409 = vmatpush.msra.mxu2 %v339_v13 }
  0xb8   :  { %v1151_v11 = vpop.permute.xlu2 %545  ;;  %244 = vst.msk [vmem:[#allocation2 + $0x40] sm:$0xf0] %vm153_vm10, %v235_v7 }
  0xbc   :  { %v1161_v16 = vpop.permute.xlu0 %571 }
  0xbd   :  { %v595_v17 = vpop.permute.xlu1 %594  ;;  %v577_v18 = vsel %vm261_vm2, %v570_v53, %v1161_v16  ;;  %v1199_v53 = vld [vmem:[%s1309_s1] sm:$0xff] }
  0xbe   :  { %v602_v19 = vsel %vm291_vm0, %v595_v17, %v1140_v63  ;;  %583 = vst [vmem:[#allocation2 + $0x48] sm:$0xf] %v577_v18  ;;  %v335_v21 = vld [vmem:[#allocation2 + $0x38] sm:$0xff]  ;;  %820 = vmatmul.msk.f32.vlgmr.msra.gmra.mxu0 %vm343_vm11, %v1199_v53 }
  0xbf   :  { %608 = vst [vmem:[#allocation2 + $0x48] sm:$0xf0] %v602_v19  ;;  %v336_v22 = vld [vmem:[#allocation2 + $0x40] sm:$0xff]  ;;  %390 = vmatpush.msra.mxu1 %v335_v21 }
  0xc0   :  { %v1167_v20 = vpop.permute.xlu2 %482  ;;  %410 = vmatpush.msra.mxu2 %v336_v22 }
  0xc4   :  { %v166_v23 = vpop.permute.xlu0 %165 }
  0xc5   :  { %v190_v24 = vpop.permute.xlu1 %189  ;;  %v169_v25 = vsel %vm167_vm6, %v1070_v12, %v166_v23  ;;  %175 = vst.msk [vmem:[#allocation2 + $0x28] sm:$0xf] %vm128_vm9, %v166_v23  ;;  %v14_v23 = vlaneseq }
  0xc6   :  { %v193_v26 = vsel %vm191_vm7, %v1123_v44, %v190_v24  ;;  %174 = vst [vmem:[#allocation2 + $0x20] sm:$0xf] %v169_v25  ;;  %v650_v28 = vld [vmem:[#allocation2 + $0x48] sm:$0xff]  ;;  %v438_v44 = vld [vmem:[%s1308_s0 + $0x10] sm:$0xf0] }
  0xc7   :  { %198 = vst [vmem:[#allocation2 + $0x20] sm:$0xf0] %v193_v26  ;;  %680 = vmatpush.msra.mxu3 %v650_v28  ;;  %v444_v45 = vrot.slane %v438_v44, 4 }
  0xc8   :  { %v628_v27 = vpop.permute.xlu2 %627  ;;  %199 = vst.msk [vmem:[#allocation2 + $0x28] sm:$0xf0] %vm153_vm10, %v190_v24  ;;  %v15_v24 = vand.u32 127, %v14_v23 }
  0xc9   :  { %v632_v29 = vsel %vm317_vm1, %v626_v1, %v628_v27 }
  0xca   :  { %638 = vst [vmem:[#allocation2 + $0x68] sm:$0xf] %v632_v29  ;;  %v21_v25 = vand.u32 65535, %v15_v24  ;;  %v22_v26 = vshrl.u32 %v15_v24, 16 }
  0xcc   :  { %v1176_v30 = vpop.permute.xlu0 %525  ;;  %v24_v28 = vmul.u32 52429, %v21_v25  ;;  %v26_v29 = vmul.u32 52429, %v22_v26 }
  0xcd   :  { %v544_v31 = vpop.permute.xlu1 %543  ;;  %v529_v12 = vsel %vm212_vm3, %v524_v4, %v1176_v30 }
  0xce   :  { %v549_v33 = vsel %vm236_vm5, %v544_v31, %v1151_v11  ;;  %534 = vst [vmem:[#allocation2 + $0x30] sm:$0xf] %v529_v12  ;;  %v332_v35 = vld [vmem:[#allocation2 + $0x20] sm:$0xff]  ;;  %v30_v31 = vshll.u32 %v26_v29, 16 }
  0xcf   :  { %554 = vst [vmem:[#allocation2 + $0x30] sm:$0xf0] %v549_v33  ;;  %v333_v36 = vld [vmem:[#allocation2 + $0x28] sm:$0xff]  ;;  %391 = vmatpush.msra.mxu1 %v332_v35  ;;  %v27_v33 = vmul.u32 52428, %v22_v26 }
  0xd0   :  { %v460_v34 = vpop.permute.xlu2 %459  ;;  %411 = vmatpush.msra.mxu2 %v333_v36 }
  0xd1   :  { %v654_v37 = vld [vmem:[#allocation2 + $0x68] sm:$0xf] }
  0xd2   :  { %827 = vmatpush.msk.msrb.mxu0 %vm347_vm4, %v654_v37 }
  0xd4   :  { %v144_v38 = vpop.permute.xlu0 %143 }
  0xd5   :  { %v481_v39 = vpop.permute.xlu1 %480  ;;  %v147_v40 = vsel %vm145_vm8, %v1107_v32, %v144_v38  ;;  %154 = vst.msk [vmem:[#allocation2 + $0x10] sm:$0xf0] %vm153_vm10, %v144_v38 }
  0xd6   :  { %v486_v41 = vsel %vm167_vm6, %v481_v39, %v1167_v20  ;;  %152 = vst [vmem:[#allocation2 + $0x8] sm:$0xf0] %v147_v40  ;;  %v647_v43 = vld [vmem:[#allocation2 + $0x30] sm:$0xff]  ;;  %v31_v39 = vshrl.u32 %v26_v29, 16 }
  0xd7   :  { %491 = vst [vmem:[#allocation2 + $0x18] sm:$0xf] %v486_v41  ;;  %681 = vmatpush.msra.mxu3 %v647_v43  ;;  %v16_v41 = vadd.s32 128, %v15_v24 }
  0xd8   :  { %v576_v42 = vpop.permute.xlu2 %575 }
  0xd9   :  { %v50_v43 = vand.u32 65535, %v16_v41  ;;  %v51_v44 = vshrl.u32 %v16_v41, 16 }
  0xdc   :  { %v501_v32 = vpop.permute.xlu0 %500  ;;  %v330_v48 = vld [vmem:[#allocation2 + $0x10] sm:$0xff] }
  0xdd   :  { %v503_v47 = vpop.permute.xlu1 %502  ;;  %412 = vmatpush.msra.mxu2 %v330_v48  ;;  %450 = vst.msk [vmem:[#allocation2 + $0x10] sm:$0xf] %vm128_vm9, %v444_v45  ;;  %v329_v50 = vld [vmem:[#allocation2 + $0x8] sm:$0xff]  ;;  %v54_v48 = vmul.u32 52428, %v50_v43 }
  0xde   :  { %v506_v49 = vsel %vm191_vm7, %v501_v32, %v503_v47  ;;  %392 = vmatpush.msra.mxu1 %v329_v50  ;;  %824 = vmatmul.msk.f32.vlgmr.msra.gmra.mxu2 %vm343_vm11, %v1199_v53  ;;  %449 = vst [vmem:[#allocation2 + $0x8] sm:$0xf] %v443_v51 }
  0xdf   :  { %511 = vst [vmem:[#allocation2 + $0x18] sm:$0xf0] %v506_v49  ;;  %822 = vmatmul.msk.f32.vlgmr.msra.gmra.mxu1 %vm343_vm11, %v1199_v53  ;;  %v55_v49 = vmul.u32 52429, %v51_v44 }
  0xe0   :  { %v548_v52 = vpop.permute.xlu2 %547 }
  0xe1   :  { %v550_v54 = vsel %vm236_vm5, %v1151_v11, %v548_v52  ;;  %556 = vst.msk [vmem:[#allocation2 + $0x40] sm:$0xf0] %vm153_vm10, %v548_v52 }
  0xe2   :  { %555 = vst [vmem:[#allocation2 + $0x38] sm:$0xf0] %v550_v54  ;;  %v57_v54 = vshll.u32 %v54_v48, 16 }
  0xe4   :  { %v630_v55 = vpop.permute.xlu0 %629 }
  0xe5   :  { %v458_v56 = vpop.permute.xlu1 %457  ;;  %v633_v57 = vsel %vm317_vm1, %v628_v27, %v630_v55  ;;  %v25_v27 = vmul.u32 52428, %v21_v25  ;;  %v59_v55 = vshll.u32 %v55_v49, 16 }
  0xe6   :  { %v463_v58 = vsel %vm145_vm8, %v458_v56, %v460_v34  ;;  %v644_v59 = vld [vmem:[#allocation2 + $0x18] sm:$0xff]  ;;  %639 = vst.msk [vmem:[#allocation2 + $0x70] sm:$0xf] %vm128_vm9, %v633_v57 }
  0xe7   :  { %682 = vmatpush.msra.mxu3 %v644_v59  ;;  %468 = vst [vmem:[#allocation2] sm:$0xf0] %v463_v58  ;;  %v29_v37 = vshrl.u32 %v25_v27, 16 }
  0xe8   :  { %v462_v60 = vpop.permute.xlu2 %461 }
  0xe9   :  { %v464_v61 = vsel %vm145_vm8, %v460_v34, %v462_v60  ;;  %470 = vst.msk [vmem:[#allocation2 + $0x10] sm:$0xf0] %vm153_vm10, %v462_v60 }
  0xea   :  { %469 = vst [vmem:[#allocation2 + $0x8] sm:$0xf0] %v464_v61 }
  0xec   :  { %v574_v0 = vpop.permute.xlu0 %573 }
  0xed   :  { %v599_v1 = vpop.permute.xlu1 %598  ;;  %v578_v3 = vsel %vm261_vm2, %v1161_v16, %v574_v0  ;;  %v579_v62 = vsel %vm261_vm2, %v574_v0, %v576_v42  ;;  %v655_v5 = vld [vmem:[#allocation2 + $0x70] sm:$0xf]  ;;  %v17_v42 = vadd.s32 256, %v15_v24 }
  0xee   :  { %v603_v4 = vsel %vm291_vm0, %v1140_v63, %v599_v1  ;;  %584 = vst [vmem:[#allocation2 + $0x50] sm:$0xf] %v578_v3  ;;  %v641_v6 = vld [vmem:[#allocation2] sm:$0xff]  ;;  %829 = vmatpush.msk.msrb.mxu1 %vm347_vm4, %v655_v5 }
  0xef   :  { %585 = vst.msk [vmem:[#allocation2 + $0x58] sm:$0xf] %vm128_vm9, %v579_v62  ;;  %683 = vmatpush.msra.mxu3 %v641_v6  ;;  %v79_v45 = vand.u32 65535, %v17_v42  ;;  %v80_v46 = vshrl.u32 %v17_v42, 16 }
  0xf0   :  { %609 = vst [vmem:[#allocation2 + $0x50] sm:$0xf0] %v603_v4  ;;  %826 = vmatmul.msk.f32.vlgmr.msra.gmra.mxu3 %vm343_vm11, %v1199_v53  ;;  %v643_v22 = vld [vmem:[#allocation2 + $0x10] sm:$0xff] }
  0xf1   :  { %v82_v50 = vmul.u32 52429, %v79_v45  ;;  %v83_v51 = vmul.u32 52428, %v79_v45  ;;  %v84_v52 = vmul.u32 52429, %v80_v46  ;;  %v85_v56 = vmul.u32 52428, %v80_v46 }
  0xf3   :  { %v86_v57 = vshll.u32 %v83_v51, 16  ;;  %v88_v58 = vshll.u32 %v84_v52, 16  ;;  %v87_v5 = vshrl.u32 %v83_v51, 16 }
  0xf4   :  { %v601_v7 = vpop.permute.xlu0 %600 }
  0xf5   :  { %v528_v8 = vpop.permute.xlu1 %527  ;;  %v604_v9 = vsel %vm291_vm0, %v599_v1, %v601_v7  ;;  %vm90_vm15 = vc.u32 %v82_v50, %v86_v57  ;;  %v92_v0 = vadd.s32 %v86_v57, %v82_v50  ;;  %v58_v1 = vshrl.u32 %v54_v48, 16 }
  0xf6   :  { %v530_v10 = vsel %vm212_vm3, %v1176_v30, %v528_v8  ;;  %536 = vst.msk [vmem:[#allocation2 + $0x40] sm:$0xf] %vm128_vm9, %v528_v8  ;;  %v28_v30 = vshll.u32 %v25_v27, 16  ;;  %v91_v62 = vsel %vm90_vm15, 1, %v855_v2  ;;  %v60_v8 = vshrl.u32 %v55_v49, 16 }
  0xf7   :  { %610 = vst.msk [vmem:[#allocation2 + $0x58] sm:$0xf0] %vm153_vm10, %v604_v9  ;;  %v651_v63 = vld [vmem:[#allocation2 + $0x50] sm:$0xff]  ;;  %v93_v6 = vadd.s32 %v91_v62, %v85_v56  ;;  %vm94_vm1 = vc.u32 %v92_v0, %v88_v58 }
  0xf8   :  { %535 = vst [vmem:[#allocation2 + $0x38] sm:$0xf] %v530_v10  ;;  %700 = vmatpush.msrb.mxu0 %v651_v63  ;;  %vm32_vm12 = vc.u32 %v24_v28, %v28_v30  ;;  %v34_v12 = vadd.s32 %v28_v30, %v24_v28  ;;  %v95_v10 = vsel %vm94_vm1, 1, %v855_v2  ;;  %v89_v63 = vshrl.u32 %v84_v52, 16 }
  0xf9   :  { %v33_v34 = vsel %vm32_vm12, 1, %v855_v2 }
  0xfa   :  { %vm36_vm13 = vc.u32 %v34_v12, %v30_v31  ;;  %v35_v35 = vadd.s32 %v33_v34, %v27_v33 }
  0xfb   :  { %v37_v36 = vsel %vm36_vm13, 1, %v855_v2 }
  0xfc   :  { %v485_v11 = vpop.permute.xlu0 %484  ;;  %v39_v38 = vadd.s32 %v37_v36, %v35_v35 }
  0xfd   :  { %v505_v13 = vpop.permute.xlu1 %504  ;;  %v487_v14 = vsel %vm167_vm6, %v1167_v20, %v485_v11  ;;  %493 = vst.msk [vmem:[#allocation2 + $0x28] sm:$0xf] %vm128_vm9, %v485_v11  ;;  %v649_v18 = vld [vmem:[#allocation2 + $0x40] sm:$0xff]  ;;  %v642_v20 = vld [vmem:[#allocation2 + $0x8] sm:$0xff]  ;;  %v97_v11 = vadd.s32 %v95_v10, %v93_v6 }
  0xfe   :  { %v507_v15 = vsel %vm191_vm7, %v503_v47, %v505_v13  ;;  %v652_v16 = vld [vmem:[#allocation2 + $0x58] sm:$0xff]  ;;  %492 = vst [vmem:[#allocation2 + $0x20] sm:$0xf] %v487_v14  ;;  %v40_v40 = vadd.s32 %v39_v38, %v29_v37  ;;  %v53_v47 = vmul.u32 52429, %v50_v43 }
  0xff   :  { %v648_v17 = vld [vmem:[#allocation2 + $0x38] sm:$0xff]  ;;  %720 = vmatpush.msrb.mxu1 %v652_v16  ;;  %512 = vst [vmem:[#allocation2 + $0x20] sm:$0xf0] %v507_v15  ;;  %v98_v14 = vadd.s32 %v97_v11, %v87_v5 }
 0x100   :  { %701 = vmatpush.msrb.mxu0 %v648_v17  ;;  %513 = vst.msk [vmem:[#allocation2 + $0x28] sm:$0xf0] %vm153_vm10, %v505_v13  ;;  %v41_v32 = vadd.s32 %v40_v40, %v31_v39  ;;  %vm61_vm14 = vc.u32 %v53_v47, %v57_v54  ;;  %v63_v60 = vadd.s32 %v57_v54, %v53_v47 }
 0x101   :  { %721 = vmatpush.msrb.mxu1 %v649_v18  ;;  %v62_v61 = vsel %vm61_vm14, 1, %v855_v2  ;;  %v99_v17 = vadd.s32 %v98_v14, %v89_v63  ;;  %vm421_vm14 = vcmask 850944  }
 0x102   :  { %v42_v59 = vshrl.u32 %v41_v32, 4  ;;  %vm65_vm0 = vc.u32 %v63_v60, %v59_v55 }
 0x103   :  { %v66_v4 = vsel %vm65_vm0, 1, %v855_v2 }
 0x104   :  { %v43_v7 = vmul.u32 20, %v42_v59 }
 0x106   :  { %v645_v19 = vld [vmem:[#allocation2 + $0x20] sm:$0xff]  ;;  %v44_v15 = vsub.s32 %v15_v24, %v43_v7 }
 0x107   :  { %v646_v21 = vld [vmem:[#allocation2 + $0x28] sm:$0xff]  ;;  %702 = vmatpush.msrb.mxu0 %v645_v19  ;;  %v100_v19 = vshrl.u32 %v99_v17, 4 }
 0x108   :  { %722 = vmatpush.msrb.mxu1 %v646_v21  ;;  %vm105_vm2 = vcmp.ne.s32.totalorder %v44_v15, 0  ;;  %vm108_vm3 = vcmp.lt.s32.totalorder %v44_v15, 0 }
 0x109   :  { %703 = vmatpush.msrb.mxu0 %v642_v20  ;;  %v114_v20 = vadd.s32 20, %v44_v15  ;;  %vm111_vm4 = vmand %vm108_vm3, %vm105_vm2 }
 0x10a   :  { %723 = vmatpush.msrb.mxu1 %v643_v22  ;;  %828 = vmatmul.msk.f32.vlgmr.msrb.gmra.mxu0 %vm343_vm11, %v1199_v53  ;;  %v101_v22 = vmul.u32 20, %v100_v19 }
 0x10b   :  { %830 = vmatmul.msk.f32.vlgmr.msrb.gmra.mxu1 %vm343_vm11, %v1199_v53  ;;  %v56_v53 = vmul.u32 52428, %v51_v44  ;;  %v117_v26 = vsel %vm111_vm4, %v114_v20, %v44_v15 }
 0x10c   :  { %v102_v25 = vsub.s32 %v17_v42, %v101_v22  ;;  %vm1245_vm11 = vcmp.lt.s32.totalorder %v117_v26, 18 }
 0x10d   :  { %v64_v3 = vadd.s32 %v62_v61, %v56_v53 }
 0x10e   :  { %vm107_vm8 = vcmp.ne.s32.totalorder %v102_v25, 0  ;;  %vm110_vm9 = vcmp.lt.s32.totalorder %v102_v25, 0  ;;  %v116_v27 = vadd.s32 20, %v102_v25 }
 0x10f   :  { %v68_v9 = vadd.s32 %v66_v4, %v64_v3  ;;  %vm113_vm10 = vmand %vm110_vm9, %vm107_vm8 }
 0x110   :  { %v119_v12 = vsel %vm113_vm10, %v116_v27, %v102_v25 }
 0x111   :  { %v69_v13 = vadd.s32 %v68_v9, %v58_v1  ;;  %vm1263_vm13 = vcmp.lt.s32.totalorder %v119_v12, 18 }
 0x113   :  { %v70_v16 = vadd.s32 %v69_v13, %v60_v8 }
 0x115   :  { %v71_v18 = vshrl.u32 %v70_v16, 4  ;;  %v761_v16 = vld [vmem:[%s1310_s2] sm:$0xff] }
 0x117   :  { %v72_v21 = vmul.u32 20, %v71_v18 }
 0x119   :  { %v73_v23 = vsub.s32 %v16_v41, %v72_v21  ;;  %v857_v21 = vmov 1  }
 0x11a   :  { %843 = vset.pattern.permute.xlu2 %v857_v21  ;;  %844 = vset.pattern.permute.xlu0 %v857_v21 }
 0x11b   :  { %vm106_vm5 = vcmp.ne.s32.totalorder %v73_v23, 0  ;;  %vm109_vm6 = vcmp.lt.s32.totalorder %v73_v23, 0  ;;  %v115_v2 = vadd.s32 20, %v73_v23 }
 0x11c   :  { %vm112_vm7 = vmand %vm109_vm6, %vm106_vm5 }
 0x11d   :  { %v118_v24 = vsel %vm112_vm7, %v115_v2, %v73_v23 }
 0x11e   :  { %vm1249_vm12 = vcmp.lt.s32.totalorder %v118_v24, 18 }
 0x13b   :  { %v1253_v30 = vpop.f32.mrf.mxu0 }
 0x13c   :  { %v417_v33 = vsel %vm1245_vm11, %v1253_v30, 0.0 }
 0x13d   :  { %v427_v36 = vmul.f32 %v417_v33, %v417_v33 }
 0x15c   :  { %v1255_v31 = vpop.f32.mrf.mxu1 }
 0x15d   :  { %v418_v34 = vsel %vm1249_vm12, %v1255_v31, 0.0 }
 0x15e   :  { %v420_v37 = vadd.f32 %v418_v34, %v417_v33  ;;  %v428_v38 = vmul.f32 %v418_v34, %v418_v34 }
 0x160   :  { %v430_v44 = vadd.f32 %v428_v38, %v427_v36 }
 0x161   :  { %v1267_v39 = vpop.f32.mrf.mxu2 }
 0x162   :  { %v419_v40 = vsel %vm1263_vm13, %v1267_v39, 0.0 }
 0x163   :  { %v422_v41 = vsel %vm421_vm14, %v419_v40, 0.0  ;;  %v429_v42 = vmul.f32 %v419_v40, %v419_v40 }
 0x164   :  { %v423_v43 = vadd.f32 %v422_v41, %v420_v37 }
 0x165   :  { %v431_v45 = vsel %vm421_vm14, %v429_v42, 0.0 }
 0x166   :  { %424 = vadd.xlane.f32.xlu0 %v423_v43  ;;  %v432_v46 = vadd.f32 %v431_v45, %v430_v44 }
 0x168   :  { %433 = vadd.xlane.f32.xlu2 %v432_v46 }
 0x173   :  { %v685_v32 = vpop.f32.mrf.mxu3 }
 0x174   :  { %v728_v47 = vsel %vm1245_vm11, %v685_v32, 0.0 }
 0x175   :  { %v737_v48 = vmul.f32 %v728_v47, %v728_v47 }
 0x187   :  { %v705_v49 = vpop.f32.mrf.mxu0 }
 0x188   :  { %v729_v50 = vsel %vm1249_vm12, %v705_v49, 0.0  ;;  %v725_v51 = vpop.f32.mrf.mxu1 }
 0x189   :  { %v731_v52 = vadd.f32 %v729_v50, %v728_v47  ;;  %v738_v53 = vmul.f32 %v729_v50, %v729_v50  ;;  %v730_v54 = vsel %vm1263_vm13, %v725_v51, 0.0 }
 0x18a   :  { %v732_v55 = vsel %vm421_vm14, %v730_v54, 0.0  ;;  %v739_v56 = vmul.f32 %v730_v54, %v730_v54 }
 0x18b   :  { %v733_v57 = vadd.f32 %v732_v55, %v731_v52  ;;  %v740_v58 = vadd.f32 %v738_v53, %v737_v48 }
 0x18c   :  { %v741_v59 = vsel %vm421_vm14, %v739_v56, 0.0 }
 0x18d   :  { %734 = vadd.xlane.f32.xlu1 %v733_v57  ;;  %v742_v60 = vadd.f32 %v741_v59, %v740_v58 }
 0x18f   :  { %743 = vadd.xlane.f32.xlu2 %v742_v60 }
 0x1d9   :  { %v425_v0 = vpop.xlane.xlu0 %424 }
 0x1db   :  { %v434_v61 = vpop.xlane.xlu2 %433 }
 0x200   :  { %v735_v1 = vpop.xlane.xlu1 %734 }
 0x201   :  { %v736_v3 = vadd.f32 %v735_v1, %v425_v0 }
 0x202   :  { %v744_v62 = vpop.xlane.xlu2 %743 }
 0x203   :  { %v746_v4 = vmul.f32 0.0015432099, %v736_v3  ;;  %v745_v5 = vadd.f32 %v744_v62, %v434_v61 }
 0x205   :  { %v748_v6 = vmul.f32 %v746_v4, %v746_v4  ;;  %v747_v7 = vmul.f32 0.0015432099, %v745_v5 }
 0x207   :  { %v749_v8 = vsub.f32 %v747_v7, %v748_v6 }
 0x209   :  { %v750_v9 = vadd.f32 1e-05, %v749_v8 }
 0x20b   :  { %845 = vrsqrt.f32 %v750_v9  ;;  %vm757_vm0 = vweird.f32 %v750_v9 }
 0x211   :  { %v846_v10 = vpop.eup %845 }
 0x212   :  { %v752_v63 = vmul.f32 %v846_v10, %v750_v9  ;;  %vm758_vm15 = vweird.f32 %v846_v10 }
 0x213   :  { %vm759_vm1 = vmor %vm757_vm0, %vm758_vm15 }
 0x214   :  { %v753_v11 = vmul.f32 %v846_v10, %v752_v63 }
 0x216   :  { %v754_v13 = vmul.f32 0.5, %v753_v11 }
 0x218   :  { %v755_v14 = vsub.f32 1.5, %v754_v13 }
 0x21a   :  { %v756_v15 = vmul.f32 %v846_v10, %v755_v14 }
 0x21c   :  { %v760_v17 = vsel %vm759_vm1, %v846_v10, %v756_v15 }
 0x21d   :  { %v762_v18 = vmul.f32 %v761_v16, %v760_v17 }
 0x21f   :  { %771 = vperm.xlu1 %842, %v762_v18   ;;  %v763_v19 = vmul.f32 %v762_v18, %v746_v4 }
 0x221   :  { %765 = vrot.lane.b32.xlu0 %v763_v19, %s856_s8 }
 0x291   :  { %v772_v23 = vpop.permute.xlu1 %771 }
 0x292   :  { %v774_v25 = vmul.f32 %v772_v23, %v1253_v30  ;;  %v775_v2 = vmul.f32 %v772_v23, %v1255_v31  ;;  %v776_v26 = vmul.f32 %v772_v23, %v1267_v39  ;;  %v797_v24 = vmul.f32 %v772_v23, %v685_v32 }
 0x293   :  { %v766_v22 = vpop.permute.xlu0 %765  ;;  %v798_v27 = vmul.f32 %v772_v23, %v705_v49  ;;  %v799_v28 = vmul.f32 %v772_v23, %v725_v51 }
 0x294   :  { %v768_v20 = vsub.f32 %v761_v16, %v766_v22 }
 0x296   :  { %779 = vperm.xlu2 %843, %v768_v20  }
 0x2f0   :  { %v780_v29 = vpop.permute.xlu2 %779 }
 0x2f1   :  { %v782_v12 = vadd.f32 %v780_v29, %v774_v25  ;;  %v783_v33 = vadd.f32 %v780_v29, %v775_v2  ;;  %v784_v34 = vadd.f32 %v780_v29, %v776_v26  ;;  %v800_v35 = vadd.f32 %v797_v24, %v780_v29 }
 0x2f2   :  { %v801_v36 = vadd.f32 %v798_v27, %v780_v29  ;;  %v802_v37 = vadd.f32 %v799_v28, %v780_v29 }
 0x2f3   :  { %vm785_vm2 = vcmp.gt.f32.partialorder %v782_v12, 0.0  ;;  %vm786_vm3 = vcmp.gt.f32.partialorder %v783_v33, 0.0  ;;  %vm787_vm4 = vcmp.gt.f32.partialorder %v784_v34, 0.0  ;;  %v788_v38 = vmul.f32 0.2, %v782_v12 }
 0x2f4   :  { %v789_v40 = vmul.f32 0.2, %v783_v33  ;;  %v790_v30 = vmul.f32 0.2, %v784_v34  ;;  %vm803_vm5 = vcmp.gt.f32.partialorder %v800_v35, 0.0  ;;  %vm804_vm6 = vcmp.gt.f32.partialorder %v801_v36, 0.0 }
 0x2f5   :  { %v791_v31 = vsel %vm785_vm2, %v782_v12, %v788_v38  ;;  %vm805_vm7 = vcmp.gt.f32.partialorder %v802_v37, 0.0  ;;  %v806_v39 = vmul.f32 0.2, %v800_v35  ;;  %v807_v41 = vmul.f32 0.2, %v801_v36 }
 0x2f6   :  { %v792_v42 = vsel %vm786_vm3, %v783_v33, %v789_v40  ;;  %v793_v43 = vsel %vm787_vm4, %v784_v34, %v790_v30  ;;  %794 = vst [vmem:[%s1311_s3] sm:$0xff] %v791_v31  ;;  %v808_v44 = vmul.f32 0.2, %v802_v37 }
 0x2f7   :  { %795 = vst [vmem:[%s1311_s3 + $0x8] sm:$0xff] %v792_v42  ;;  %v809_v45 = vsel %vm803_vm5, %v800_v35, %v806_v39  ;;  %v810_v46 = vsel %vm804_vm6, %v801_v36, %v807_v41 }
 0x2f8   :  { %796 = vst.msk [vmem:[%s1311_s3 + $0x10] sm:$0xff] %vm421_vm14, %v793_v43  ;;  %v811_v32 = vsel %vm805_vm7, %v802_v37, %v808_v44 }
 0x2f9   :  { %812 = vst [vmem:[%s1311_s3 + $0x18] sm:$0xff] %v809_v45 }
 0x2fa   :  { %813 = vst [vmem:[%s1311_s3 + $0x20] sm:$0xff] %v810_v46 }
 0x2fb   :  { %814 = vst.msk [vmem:[%s1311_s3 + $0x28] sm:$0xff] %vm421_vm14, %v811_v32 }

</bundles_post_ra>
